<compile_context>
chip_gen: v7x
topology: tpu7x:2x2x1
jax: 0.10.0
libtpu: 0.0.40
codegen_flags: <defaults>
</compile_context>

<pallas_src>
import functools

import jax
import jax.numpy as jnp
from jax.experimental import pallas as pl
from jax.experimental.pallas import tpu as pltpu

_N_INFLIGHT = 8      # concurrent row DMAs in the HBM-gather path
_MAX_TILE_T = 128    # tokens per grid step


def _round_up(x: int, m: int) -> int:
    return (x + m - 1) // m * m


def _vmem_capacity_bytes() -> int:
    try:
        return int(pltpu.get_tpu_info().vmem_capacity_bytes)
    except Exception:
        return 64 * 1024 * 1024  # conservative default (v7x has 64 MiB per TC)


# ------------------------------------------------------------------ kernels --

def _gather_vmem_kernel(ids_ref, emb_ref, out_ref, *, tile_t):
    """Embedding table resident in VMEM; copy one row per token of this tile."""
    base = pl.program_id(0) * tile_t

    @pl.loop(0, tile_t)
    def _(t):
        idx = ids_ref[base + t]
        out_ref[pl.ds(t, 1), :] = emb_ref[pl.ds(idx, 1), :]


def _gather_hbm_kernel(ids_ref, emb_hbm_ref, out_ref, stage_ref, sems, *, tile_t):
    """Table stays in HBM; stream per-token row DMAs with _N_INFLIGHT in flight."""
    base = pl.program_id(0) * tile_t

    def row_copy(t):
        idx = ids_ref[base + t]
        return pltpu.make_async_copy(
            emb_hbm_ref.at[idx], stage_ref.at[t], sems.at[t % _N_INFLIGHT])

    # Prologue: prime the DMA pipeline (static, small Python loop).
    for t in range(min(_N_INFLIGHT, tile_t)):
        row_copy(t).start()

    @pl.loop(0, tile_t)
    def _(t):
        row_copy(t).wait()

        @pl.when(t + _N_INFLIGHT < tile_t)
        def _():
            # NOTE: pad tokens still fetch the (zero) pad row; skipping their DMA
            # is a further optimization for heavily padded batches.
            row_copy(t + _N_INFLIGHT).start()

    # Single lane-dense, sublane-full tile store into the output block.
    out_ref[...] = stage_ref[...]


# ------------------------------------------------------------------ wrapper --

def token_embeddings_pallas(token_ids: jax.Array, emb_table: jax.Array,
                            *, force_hbm_gather: bool = False) -> jax.Array:
    """Embedding lookup: out[..., :] = emb_table[token_ids[...], :]."""
    orig_shape = token_ids.shape
    vocab_size, emb_dim = emb_table.shape

    flat_ids = token_ids.reshape(-1).astype(jnp.int32)
    # Safety clamp: an out-of-range id would otherwise index / DMA out of bounds.
    flat_ids = jnp.clip(flat_ids, 0, vocab_size - 1)

    num_tokens = flat_ids.shape[0]
    tile_t = min(_MAX_TILE_T, _round_up(num_tokens, 8))
    padded_t = _round_up(num_tokens, tile_t)
    if padded_t != num_tokens:
        flat_ids = jnp.pad(flat_ids, (0, padded_t - num_tokens))
    grid = (padded_t // tile_t,)

    itemsize = jnp.dtype(emb_table.dtype).itemsize
    table_bytes = vocab_size * emb_dim * itemsize
    tile_bytes = tile_t * emb_dim * itemsize

    vmem_cap = _vmem_capacity_bytes()
    table_budget = int(vmem_cap * 0.375)  # ~24 MiB on v7x, ~48 MiB on v5e/v6e
    # VMEM-resident path restricted to 32-bit tables (dynamic sublane indexing of
    # packed dtypes is layout-sensitive); sub-32-bit tables take the DMA-gather
    # path, which is dtype agnostic.
    use_vmem_table = (not force_hbm_gather
                      and itemsize == 4
                      and table_bytes <= table_budget)

    out_spec = pl.BlockSpec((tile_t, emb_dim), lambda i, ids: (i, 0))
    out_shape = jax.ShapeDtypeStruct((padded_t, emb_dim), emb_table.dtype)

    if use_vmem_table:
        kernel = functools.partial(_gather_vmem_kernel, tile_t=tile_t)
        grid_spec = pltpu.PrefetchScalarGridSpec(
            num_scalar_prefetch=1,
            grid=grid,
            in_specs=[
                # Full table, constant block index -> loaded to VMEM once.
                pl.BlockSpec((vocab_size, emb_dim), lambda i, ids: (0, 0)),
            ],
            out_specs=out_spec,
        )
        vmem_needed = table_bytes + 4 * tile_bytes + (2 << 20)
        bytes_accessed = table_bytes + 2 * padded_t * emb_dim * itemsize
    else:
        kernel = functools.partial(_gather_hbm_kernel, tile_t=tile_t)
        grid_spec = pltpu.PrefetchScalarGridSpec(
            num_scalar_prefetch=1,
            grid=grid,
            in_specs=[pl.BlockSpec(memory_space=pl.ANY)],  # raw HBM ref
            out_specs=out_spec,
            scratch_shapes=[
                pltpu.VMEM((tile_t, emb_dim), emb_table.dtype),
                pltpu.SemaphoreType.DMA((_N_INFLIGHT,)),
            ],
        )
        vmem_needed = 6 * tile_bytes + (2 << 20)
        bytes_accessed = 2 * padded_t * emb_dim * itemsize

    vmem_limit = int(min(vmem_cap - (4 << 20), max(vmem_needed, 32 << 20)))

    out_flat = pl.pallas_call(
        kernel,
        out_shape=out_shape,
        grid_spec=grid_spec,
        compiler_params=pltpu.CompilerParams(
            dimension_semantics=("parallel",),   # output blocks written once
            vmem_limit_bytes=vmem_limit,
        ),
        cost_estimate=pl.CostEstimate(
            flops=0, transcendentals=0, bytes_accessed=int(bytes_accessed)),
    )(flat_ids, emb_table)

    return out_flat[:num_tokens].reshape(*orig_shape, emb_dim)


def init_token_embeddings(key, vocab_size: int, embedding_dimension: int,
                          pad_token_idx):
    """Deterministic init mirroring nn.Embedding: N(0,1), pad row zeroed."""
    w = jax.random.normal(key, (vocab_size, embedding_dimension), dtype=jnp.float32)
    if pad_token_idx is not None:
        w = w.at[pad_token_idx, :].set(0.0)
    return w


# TODO(synk): padding_idx gradient masking (backward pass) is not implemented;
# forward semantics are preserved via the pre-zeroed pad row.

if __name__ == "__main__":
    VOCAB = 64
    EMB_DIM = 128
    PAD_IDX = 0
    B, S = 2, 8

    key = jax.random.PRNGKey(0)
    k_emb, k_ids = jax.random.split(key)

    emb_table = init_token_embeddings(k_emb, VOCAB, EMB_DIM, PAD_IDX)
    token_ids = jax.random.randint(k_ids, (B, S), 0, VOCAB, dtype=jnp.int32)
    token_ids = token_ids.at[:, -2:].set(PAD_IDX)   # include padding tokens

    ref = jnp.take(emb_table, token_ids, axis=0)

    # Path 1: table resident in VMEM (small table), batched token tile.
    out = jax.block_until_ready(token_embeddings_pallas(token_ids, emb_table))
    assert out.shape == (B, S, EMB_DIM)
    assert jnp.allclose(out, ref), "VMEM-path mismatch vs reference"
    assert jnp.all(out[:, -2:, :] == 0.0), "padding rows must be zero"

    # Path 2: HBM DMA-gather path, exercised via the bf16 table code path.
    emb_bf16 = emb_table.astype(jnp.bfloat16)
    out_bf16 = jax.block_until_ready(token_embeddings_pallas(token_ids, emb_bf16))
    ref_bf16 = jnp.take(emb_bf16, token_ids, axis=0)
    assert out_bf16.dtype == jnp.bfloat16
    assert jnp.array_equal(out_bf16, ref_bf16), "HBM-path (bf16) mismatch vs reference"

    # Path 2 forced with f32 as well (large-table fallback coverage).
    out_hbm = jax.block_until_ready(
        token_embeddings_pallas(token_ids, emb_table, force_hbm_gather=True))
    assert jnp.allclose(out_hbm, ref), "HBM-path (f32) mismatch vs reference"

    print("KERNEL_OK")
</pallas_src>

<mosaic_0001>
module attributes {stable_mosaic.version = 11 : i64} {
  func.func @_gather_vmem_kernel(%arg0: i32, %arg1: memref<16xi32, #tpu.memory_space<smem>>, %arg2: memref<64x128xf32, #tpu.memory_space<vmem>>, %arg3: memref<16x128xf32, #tpu.memory_space<vmem>>) attributes {dimension_semantics = [#tpu.dimension_semantics<parallel>], iteration_bounds = array<i64: 1>, scalar_prefetch = 1 : i64, scratch_operands = 0 : i64, tpu.core_type = #tpu.core_type<tc>, window_params = [{pipeline_mode = #tpu.pipeline_mode<synchronous>, transform_indices = @transform_0, window_bounds = array<i64: 64, 128>}, {transform_indices = @transform_1, window_bounds = array<i64: 16, 128>}]} {
    %c16_i32 = arith.constant 16 : i32
    %0 = arith.muli %arg0, %c16_i32 : i32
    %c0_i32 = arith.constant 0 : i32
    %c16_i32_0 = arith.constant 16 : i32
    %1 = arith.addi %c0_i32, %c16_i32_0 : i32
    %c1_i32 = arith.constant 1 : i32
    scf.for %arg4 = %c0_i32 to %1 step %c1_i32  : i32 {
      %c1_i32_2 = arith.constant 1 : i32
      %2 = arith.muli %arg4, %c1_i32_2 : i32
      %c0_i32_3 = arith.constant 0 : i32
      %3 = arith.addi %c0_i32_3, %2 : i32
      %4 = arith.addi %0, %3 : i32
      %5 = arith.index_cast %4 : i32 to index
      %6 = memref.load %arg1[%5] : memref<16xi32, #tpu.memory_space<smem>>
      %7 = arith.index_cast %6 : i32 to index
      %c0 = arith.constant 0 : index
      %8 = vector.load %arg2[%7, %c0] : memref<64x128xf32, #tpu.memory_space<vmem>>, vector<1x128xf32>
      %9 = arith.index_cast %3 : i32 to index
      %c0_4 = arith.constant 0 : index
      %10 = vector.load %arg3[%9, %c0_4] : memref<16x128xf32, #tpu.memory_space<vmem>>, vector<1x128xf32>
      tpu.vector_store %arg3[%9, %c0_4], %8 {strides = array<i32>} : memref<16x128xf32, #tpu.memory_space<vmem>>, vector<1x128xf32>,
    }
    %c16_i32_1 = arith.constant 16 : i32
    return
  }
  func.func @transform_0(%arg0: i32, %arg1: memref<16xi32, #tpu.memory_space<smem>>) -> (i32, i32) {
    %c0_i32 = arith.constant 0 : i32
    %c0_i32_0 = arith.constant 0 : i32
    %c0_i32_1 = arith.constant 0 : i32
    return %c0_i32, %c0_i32_0 : i32, i32
  }
  func.func @transform_1(%arg0: i32, %arg1: memref<16xi32, #tpu.memory_space<smem>>) -> (i32, i32) {
    %c0_i32 = arith.constant 0 : i32
    %c0_i32_0 = arith.constant 0 : i32
    return %arg0, %c0_i32 : i32, i32
  }
}

</mosaic_0001>

<bundles_post_ra>
// kernel: tpu_custom_call.1
= control target key start
LH: loop header
LB: loop body
LE: loop exit
PB: predicated region body
PF: predicated region fallthrough
CT: control target
= control target key end

     0   :  { %s208_s0 = inlined_call_operand.hbm [shape: s32[16], index: 0, kind: input, shape index: {}]   ;;  %s209_s1 = inlined_call_operand.hbm [shape: f32[64,128], index: 1, kind: input, shape index: {}]   ;;  %s210_s2 = inlined_call_operand.hbm [shape: f32[16,128], index: 2, kind: output, shape index: {}]  }
   0x1   :  { %s78_s11 = scalar_lea.hbm %s208_s0, 16 }
   0x2   :  { %p79_p0 = scmp.ne.s32.totalorder %s208_s0, %s78_s11  ;;  %p82_p1 = scmp.lt.u32.totalorder %s78_s11, %s208_s0 }
   0x4   :  { %p84_p2 = pnand %p82_p1, %p79_p0 }
   0x6   :  { %87 = shalt.err (!%p84_p2)  }
   0x7   :  { %s146_s16 = smov [#allocation3]  }
   0x8   :  { %8 = dma.hbm_to_smem %s208_s0, 16, %s146_s16, [#allocation2] }
   0x9   :  { %136 = dma.done.wait [#allocation2], 16 }
   0xa   :  { %137 = vsyncadd [#allocation2], 4294967280 }
   0xb   :  { %10 = sfence }
   0xc   :  { %11 = vsyncpa [#allocation5], 0 }
   0xd   :  { %12 = vsyncpa [#allocation6], 0  ;;  %s147_s19 = smov [#allocation4]   ;;  %s88_s23 = scalar_lea.hbm %s209_s1, 1024 }
   0xe   :  { %s18_s20 = sshll.u32 %s147_s19, 4  ;;  %p89_p3 = scmp.ne.s32.totalorder %s209_s1, %s88_s23  ;;  %s19_s20 = int_to_ptr.vmem [resolvable:$true] %s18_s20 }
   0xf   :  { %p92_p4 = scmp.lt.u32.totalorder %s88_s23, %s209_s1 }
  0x11   :  { %p94_p5 = pnand %p92_p4, %p89_p3 }
  0x13   :  { %97 = shalt.err (!%p94_p5)
}
  0x14   :  { %s98_s0 = scalar_lea.vmem %s19_s20, 1024  ;;  %p103_p7 = scmp.lt.s32.totalorder %s19_s20, %s19_s20 }
  0x15   :  { %p99_p6 = scmp.ne.s32.totalorder %s19_s20, %s98_s0  ;;  %p104_p8 = scmp.lt.s32.totalorder %s98_s0, %s98_s0 }
  0x17   :  { %p105_p9 = por %p104_p8, %p103_p7 }
  0x19   :  { %p106_p10 = pnand %p105_p9, %p99_p6 }
  0x1b   :  { %109 = shalt.err (!%p106_p10)
}
  0x1c   :  { %s148_s28 = smov 128   ;;  %s149_s29 = smov 8  }
  0x1d   :  { %24 = dma.hbm_to_vmem [thread:$0]  %s209_s1, 1024, %s19_s20, [#allocation5], %s148_s28, %s148_s28, %s149_s29  }
  0x1e   :  { %138 = dma.done.wait [#allocation5], 1024  }
  0x1f   :  { %139 = vsyncadd [#allocation5], 4294966272  ;;  %s142_s4 = smov 0  }
  0x20 LB: > { %s36_s5 = sld [smem:[#allocation3 + %s144_s4]]  ;;  %s39_s7 = scalar_lea.vmem [#allocation7], %s144_s4  ;;  %s144_s4 = sphi %s142_s4, %s34_s4  }
  0x21   : > { %s34_s4 = sadd.s32 1, %s144_s4  }
  0x22   : > { %p31_p11 = scmp.ge.s32.totalorder %s34_s4, 16  }
  0x23   :  { %s150_s8 = smov (%p31_p11), [#allocation7]  }
  0x24   :  { %33 = sbr.rel (!%p31_p11) target bundleno = 32 (0x20), region = 37  ;;  %s46_s9 = sshll.u32 (%p31_p11), %s150_s8, 4  ;;  %s47_s9 = int_to_ptr.vmem [resolvable:$true] %s46_s9 }
  0x25   :  { %s110_s10 = scalar_lea.vmem (%p31_p11), %s47_s9, 256  ;;  %p115_p13 = scmp.lt.s32.totalorder (%p31_p11), %s47_s9, %s47_s9 }
  0x26   : > { %s37_s6 = scalar_lea.vmem [#allocation4], %s36_s5  ;;  %p111_p12 = scmp.ne.s32.totalorder (%p31_p11), %s47_s9, %s110_s10 }
  0x27   : > { %v38_v0 = vld [vmem:[%s37_s6] sm:$0x1]  ;;  %p116_p0 = scmp.lt.s32.totalorder (%p31_p11), %s110_s10, %s110_s10 }
  0x28   : > { %40 = vst [vmem:[%s39_s7] sm:$0x1] %v38_v0 }
  0x29   :  { %p117_p1 = por (%p31_p11), %p116_p0, %p115_p13 }
  0x2b   :  { %p118_p2 = pnand %p117_p1, %p111_p12 }
  0x2d   :  { %121 = shalt.err (!%p118_p2)
}
  0x2e   :  { %s122_s12 = scalar_lea.hbm %s210_s2, 256 }
  0x2f   :  { %p123_p3 = scmp.ne.s32.totalorder %s210_s2, %s122_s12  ;;  %p126_p4 = scmp.lt.u32.totalorder %s122_s12, %s210_s2 }
  0x31   :  { %p128_p5 = pnand %p126_p4, %p123_p3 }
  0x33   :  { %131 = shalt.err (!%p128_p5)
}
  0x34   :  { %52 = dma.vmem_to_hbm [thread:$0]  %s47_s9, 256, %s210_s2, [#allocation6], %s148_s28, %s148_s28, %s149_s29  }
  0x35   :  { %140 = dma.done.wait [#allocation6], 256  }
  0x36   :  { %141 = vsyncadd [#allocation6], 4294967040 }
  0x37   :  { %56 = vsyncpa [#allocation5], 1 }
  0x38   :  { %57 = vsyncpa [#allocation6], 1 }

</bundles_post_ra>
